<compile_context>
chip_gen: v5e
topology: v5e:2x2
jax: 0.10.0
libtpu: 0.0.40
codegen_flags: <defaults>
</compile_context>

<pallas_src>
import functools

import jax
import jax.numpy as jnp
from jax.experimental import pallas as pl
from jax.experimental.pallas import tpu as pltpu


def _dropout_kernel(seed_ref, x_ref, o_ref, *, p: float, tm: int, ncols: int):
    # Static constants.
    threshold = jnp.uint32(min(int(round(p * float(2**32))), 2**32 - 1))
    scale = 1.0 / (1.0 - p)

    shape = x_ref.shape  # (tm, ncols) block (possibly full-array for tiny inputs)

    # Global element index of every element in this block (deterministic w.r.t.
    # the flattened tensor, independent of grid tiling / core assignment).
    row = jax.lax.broadcasted_iota(jnp.int32, shape, 0).astype(jnp.uint32)
    col = jax.lax.broadcasted_iota(jnp.int32, shape, 1).astype(jnp.uint32)
    row0 = (pl.program_id(0) * tm).astype(jnp.uint32)
    idx = (row + row0) * jnp.uint32(ncols) + col

    # Counter-based hash PRNG: mix seed + index, then a murmur3-style finalizer.
    seed = seed_ref[0].astype(jnp.uint32)
    h = idx * jnp.uint32(0x9E3779B9) + seed * jnp.uint32(0x85EBCA6B)
    h = h ^ (h >> 16)
    h = h * jnp.uint32(0x7FEB352D)
    h = h ^ (h >> 15)
    h = h * jnp.uint32(0x846CA68B)
    h = h ^ (h >> 16)

    # Keep with probability (1 - p): uniform uint32 >= p * 2^32.
    keep = h >= threshold

    x = x_ref[...]
    scale_c = jnp.asarray(scale, dtype=x.dtype)  # mask/scale in native dtype
    o_ref[...] = jnp.where(keep, x * scale_c, jnp.zeros_like(x))


def _pick_lane_width(total: int, last_dim: int) -> int:
    # Prefer a large multiple of 128 so the last dim fills all lanes.
    for cand in (2048, 1024, 512, 256, 128):
        if total % cand == 0:
            return cand
    return last_dim  # fallback: keep original layout (full-dim block still legal)


def dropout(x: jax.Array, p: float, *, seed: int = 0, training: bool = True) -> jax.Array:
    """Forward pass of the Dropout module (inverted dropout when training)."""
    if (not training) or p <= 0.0:
        # Matches `if self.training and self.p > 0`: identity otherwise.
        return x
    if p >= 1.0:
        return jnp.zeros_like(x)

    orig_shape = x.shape
    total = x.size
    lane = _pick_lane_width(total, orig_shape[-1])
    x2 = x.reshape(-1, lane)
    M, N = x2.shape

    # Row-tile so each block is ~1 MiB (double-buffered in+out stays well under
    # the scoped VMEM limit on all of v5e / v6e / v7x).
    bytes_per_row = max(N * x2.dtype.itemsize, 1)
    tm = max(8, ((1 << 20) // bytes_per_row) // 8 * 8)
    if tm >= M:
        tm = M  # full-dim block is always legal, even if M isn't a multiple of 8
    grid = (pl.cdiv(M, tm),)

    out = pl.pallas_call(
        functools.partial(_dropout_kernel, p=float(p), tm=tm, ncols=N),
        out_shape=jax.ShapeDtypeStruct((M, N), x.dtype),
        grid_spec=pltpu.PrefetchScalarGridSpec(
            num_scalar_prefetch=1,
            grid=grid,
            in_specs=[pl.BlockSpec((tm, N), lambda i, seed_ref: (i, 0))],
            out_specs=pl.BlockSpec((tm, N), lambda i, seed_ref: (i, 0)),
        ),
        compiler_params=pltpu.CompilerParams(
            dimension_semantics=("parallel",),
            vmem_limit_bytes=32 * 1024 * 1024,
        ),
    )(jnp.asarray([seed], dtype=jnp.int32), x2)

    return out.reshape(orig_shape)


if __name__ == "__main__":
    key = jax.random.PRNGKey(0)
    batch, seq, hidden = 2, 8, 32
    x = jax.random.normal(key, (batch, seq, hidden), dtype=jnp.float32)

    p = 0.5

    # Training path (dropout applied inside the Pallas kernel).
    y_train = jax.block_until_ready(dropout(x, p, seed=0, training=True))

    # Eval path (identity, mirrors the PyTorch gate).
    y_eval = jax.block_until_ready(dropout(x, p, seed=0, training=False))

    # Sanity checks.
    assert y_train.shape == x.shape and y_train.dtype == x.dtype
    assert jnp.allclose(y_eval, x)

    scaled = x / (1.0 - p)
    is_zero = jnp.isclose(y_train, 0.0)
    is_scaled = jnp.isclose(y_train, scaled, rtol=1e-5, atol=1e-6)
    assert bool(jnp.all(is_zero | is_scaled))

    # Loose statistical check: keep fraction should be roughly (1 - p).
    keep_frac = float(jnp.mean((~is_zero).astype(jnp.float32)))
    assert 0.1 < keep_frac < 0.9

    print("KERNEL_OK")
</pallas_src>

<mosaic_0001>
module attributes {stable_mosaic.version = 11 : i64} {
  func.func @_dropout_kernel(%arg0: i32, %arg1: memref<1xi32, #tpu.memory_space<smem>>, %arg2: memref<1x512xf32, #tpu.memory_space<vmem>>, %arg3: memref<1x512xf32, #tpu.memory_space<vmem>>) attributes {dimension_semantics = [#tpu.dimension_semantics<parallel>], iteration_bounds = array<i64: 1>, scalar_prefetch = 1 : i64, scratch_operands = 0 : i64, tpu.core_type = #tpu.core_type<tc>, window_params = [{transform_indices = @transform_0, window_bounds = array<i64: 1, 512>}, {transform_indices = @transform_1, window_bounds = array<i64: 1, 512>}]} {
    %0 = tpu.iota {dimensions = array<i32: 0>} : vector<1x512xi32>
    %1 = tpu.iota {dimensions = array<i32: 1>} : vector<1x512xi32>
    %c1_i32 = arith.constant 1 : i32
    %2 = arith.muli %arg0, %c1_i32 : i32
    %3 = vector.broadcast %2 : i32 to vector<1x512xi32>
    %4 = arith.addi %0, %3 : vector<1x512xi32>
    %c512_i32 = arith.constant 512 : i32
    %5 = vector.broadcast %c512_i32 : i32 to vector<1x512xi32>
    %6 = arith.muli %4, %5 : vector<1x512xi32>
    %7 = arith.addi %6, %1 : vector<1x512xi32>
    %c0 = arith.constant 0 : index
    %8 = memref.load %arg1[%c0] : memref<1xi32, #tpu.memory_space<smem>>
    %c-1640531527_i32 = arith.constant -1640531527 : i32
    %9 = vector.broadcast %c-1640531527_i32 : i32 to vector<1x512xi32>
    %10 = arith.muli %7, %9 : vector<1x512xi32>
    %c-2048144789_i32 = arith.constant -2048144789 : i32
    %11 = arith.muli %8, %c-2048144789_i32 : i32
    %12 = vector.broadcast %11 : i32 to vector<1x512xi32>
    %13 = arith.addi %10, %12 : vector<1x512xi32>
    %c16_i32 = arith.constant 16 : i32
    %14 = vector.broadcast %c16_i32 : i32 to vector<1x512xi32>
    %15 = arith.shrui %13, %14 : vector<1x512xi32>
    %16 = arith.xori %13, %15 : vector<1x512xi32>
    %c2146121005_i32 = arith.constant 2146121005 : i32
    %17 = vector.broadcast %c2146121005_i32 : i32 to vector<1x512xi32>
    %18 = arith.muli %16, %17 : vector<1x512xi32>
    %c15_i32 = arith.constant 15 : i32
    %19 = vector.broadcast %c15_i32 : i32 to vector<1x512xi32>
    %20 = arith.shrui %18, %19 : vector<1x512xi32>
    %21 = arith.xori %18, %20 : vector<1x512xi32>
    %c-2073254261_i32 = arith.constant -2073254261 : i32
    %22 = vector.broadcast %c-2073254261_i32 : i32 to vector<1x512xi32>
    %23 = arith.muli %21, %22 : vector<1x512xi32>
    %c16_i32_0 = arith.constant 16 : i32
    %24 = vector.broadcast %c16_i32_0 : i32 to vector<1x512xi32>
    %25 = arith.shrui %23, %24 : vector<1x512xi32>
    %26 = arith.xori %23, %25 : vector<1x512xi32>
    %c-2147483648_i32 = arith.constant -2147483648 : i32
    %27 = vector.broadcast %c-2147483648_i32 : i32 to vector<1x512xi32>
    %28 = arith.cmpi uge, %26, %27 : vector<1x512xi32>
    %c0_1 = arith.constant 0 : index
    %c0_2 = arith.constant 0 : index
    %29 = vector.load %arg2[%c0_1, %c0_2] : memref<1x512xf32, #tpu.memory_space<vmem>>, vector<1x512xf32>
    %cst = arith.constant 2.000000e+00 : f32
    %30 = vector.broadcast %cst : f32 to vector<1x512xf32>
    %31 = arith.mulf %29, %30 : vector<1x512xf32>
    %cst_3 = arith.constant 0.000000e+00 : f32
    %32 = vector.broadcast %cst_3 : f32 to vector<1x512xf32>
    %33 = arith.select %28, %31, %32 : vector<1x512xi1>, vector<1x512xf32>
    %c0_4 = arith.constant 0 : index
    %c0_5 = arith.constant 0 : index
    %34 = vector.load %arg3[%c0_4, %c0_5] : memref<1x512xf32, #tpu.memory_space<vmem>>, vector<1x512xf32>
    tpu.vector_store %arg3[%c0_4, %c0_5], %33 {strides = array<i32>} : memref<1x512xf32, #tpu.memory_space<vmem>>, vector<1x512xf32>,
    return
  }
  func.func @transform_0(%arg0: i32, %arg1: memref<1xi32, #tpu.memory_space<smem>>) -> (i32, i32) {
    %c0_i32 = arith.constant 0 : i32
    %c0_i32_0 = arith.constant 0 : i32
    return %arg0, %c0_i32 : i32, i32
  }
  func.func @transform_1(%arg0: i32, %arg1: memref<1xi32, #tpu.memory_space<smem>>) -> (i32, i32) {
    %c0_i32 = arith.constant 0 : i32
    %c0_i32_0 = arith.constant 0 : i32
    return %arg0, %c0_i32 : i32, i32
  }
}

</mosaic_0001>

<bundles_post_ra>
// kernel: tpu_custom_call.1
= control target key start
LH: loop header
LB: loop body
LE: loop exit
PB: predicated region body
PF: predicated region fallthrough
CT: control target
= control target key end

     0   :  { %8 = vsyncpa [#allocation5], 0  ;;  %s232_s0 = inlined_call_operand.<no memory space> [shape: s32[1], index: 0, kind: input, shape index: {}]   ;;  %s233_s1 = inlined_call_operand.hbm [shape: f32[1,512], index: 1, kind: input, shape index: {}]   ;;  %s234_s2 = inlined_call_operand.hbm [shape: f32[1,512], index: 2, kind: output, shape index: {}]  }
   0x1   :  { %9 = vsyncpa [#allocation6], 0  ;;  %s15_s11 = sshll.u32 %s233_s1, 4  ;;  %s203_s12 = smov [#allocation4]   ;;  %s16_s11 = int_to_ptr.hbm [resolvable:$true] %s15_s11 }
   0x2   :  { %s17_s13 = sshll.u32 %s203_s12, 4  ;;  %s18_s13 = int_to_ptr.vmem [resolvable:$true] %s17_s13 }
   0x3   :  { %20 = dma.hbm_to_vmem [thread:$0]  %s16_s11, 64, %s18_s13, [#allocation5]  }
   0x4   :  { %199 = dma.done.wait [#allocation5], 64  }
   0x5   :  { %200 = vsyncadd [#allocation5], 4294967232  ;;  %v25_v0 = vlaneseq  ;;  %s44_s16 = smul.u32 2246822507, %s232_s0  ;;  %v94_v36 = vld [vmem:[#allocation4] sm:$0xf] }
   0x6   :  { %v95_v43 = vmul.f32 2.0, %v94_v36  ;;  %vm116_vm2 = vcmask 1040384   ;;  %vm118_vm5 = vcmask 1042434   ;;  %s204_s0 = smov [#allocation7]   ;;  %s135_s19 = sshll.u32 %s234_s2, 4  ;;  %vm120_vm6 = vcmask 1041408   ;;  %s136_s19 = int_to_ptr.hbm [resolvable:$true] %s135_s19 }
   0x7   :  { %v26_v1 = vshrl.u32 %v25_v0, 7  ;;  %v28_v2 = vand.u32 127, %v25_v0  ;;  %v45_v11 = vstv %s44_s16  ;;  %s133_s1 = sshll.u32 %s204_s0, 4  ;;  %vm125_vm7 = vcmp.lt.s32.totalorder %v25_v0, 512  ;;  %s134_s1 = int_to_ptr.vmem [resolvable:$true] %s133_s1 }
   0x8   :  { %v97_v54 = vperm.slane %v95_v43, 0  ;;  %v98_v55 = vperm.slane %v95_v43, 1  ;;  %v99_v58 = vperm.slane %v95_v43, 2  ;;  %v100_v59 = vperm.slane %v95_v43, 3 }
   0x9   :  { %v29_v3 = vadd.s32 128, %v28_v2  ;;  %v30_v4 = vadd.s32 256, %v28_v2  ;;  %v31_v5 = vadd.s32 384, %v28_v2  ;;  %v34_v6 = vmul.u32 512, %v26_v1 }
   0xb   :  { %v35_v7 = vadd.s32 %v34_v6, %v28_v2  ;;  %v36_v8 = vadd.s32 %v34_v6, %v29_v3  ;;  %v37_v9 = vadd.s32 %v34_v6, %v30_v4  ;;  %v38_v10 = vadd.s32 %v34_v6, %v31_v5 }
   0xd   :  { %v40_v12 = vmul.u32 2654435769, %v35_v7  ;;  %v41_v13 = vmul.u32 2654435769, %v36_v8  ;;  %v42_v14 = vmul.u32 2654435769, %v37_v9 }
   0xe   :  { %v43_v15 = vmul.u32 2654435769, %v38_v10 }
   0xf   :  { %v46_v16 = vadd.s32 %v45_v11, %v40_v12  ;;  %v47_v17 = vadd.s32 %v45_v11, %v41_v13  ;;  %v48_v18 = vadd.s32 %v45_v11, %v42_v14 }
  0x10   :  { %v49_v19 = vadd.s32 %v45_v11, %v43_v15 }
  0x11   :  { %v50_v20 = vshrl.u32 %v46_v16, 16  ;;  %v51_v21 = vshrl.u32 %v47_v17, 16  ;;  %v52_v22 = vshrl.u32 %v48_v18, 16 }
  0x12   :  { %v53_v23 = vshrl.u32 %v49_v19, 16 }
  0x13   :  { %v54_v24 = vxor.u32 %v50_v20, %v46_v16  ;;  %v55_v25 = vxor.u32 %v51_v21, %v47_v17  ;;  %v56_v26 = vxor.u32 %v52_v22, %v48_v18 }
  0x14   :  { %v57_v27 = vxor.u32 %v53_v23, %v49_v19 }
  0x15   :  { %v58_v28 = vmul.u32 2146121005, %v54_v24  ;;  %v59_v29 = vmul.u32 2146121005, %v55_v25  ;;  %v60_v30 = vmul.u32 2146121005, %v56_v26 }
  0x16   :  { %v61_v31 = vmul.u32 2146121005, %v57_v27 }
  0x17   :  { %v62_v32 = vshrl.u32 %v58_v28, 15  ;;  %v63_v33 = vshrl.u32 %v59_v29, 15  ;;  %v64_v34 = vshrl.u32 %v60_v30, 15 }
  0x18   :  { %v65_v35 = vshrl.u32 %v61_v31, 15 }
  0x19   :  { %v66_v37 = vxor.u32 %v62_v32, %v58_v28  ;;  %v67_v38 = vxor.u32 %v63_v33, %v59_v29  ;;  %v68_v39 = vxor.u32 %v64_v34, %v60_v30 }
  0x1a   :  { %v69_v40 = vxor.u32 %v65_v35, %v61_v31 }
  0x1b   :  { %v70_v41 = vmul.u32 2221713035, %v66_v37  ;;  %v71_v42 = vmul.u32 2221713035, %v67_v38  ;;  %v72_v44 = vmul.u32 2221713035, %v68_v39 }
  0x1c   :  { %v73_v45 = vmul.u32 2221713035, %v69_v40 }
  0x1d   :  { %v74_v46 = vshrl.u32 %v70_v41, 16  ;;  %v75_v47 = vshrl.u32 %v71_v42, 16  ;;  %v76_v48 = vshrl.u32 %v72_v44, 16 }
  0x1e   :  { %v77_v49 = vshrl.u32 %v73_v45, 16 }
  0x1f   :  { %v78_v50 = vxor.u32 %v74_v46, %v70_v41  ;;  %v79_v51 = vxor.u32 %v75_v47, %v71_v42  ;;  %v80_v52 = vxor.u32 %v76_v48, %v72_v44 }
  0x20   :  { %v81_v53 = vxor.u32 %v77_v49, %v73_v45 }
  0x21   :  { %v145_v56 = vxor.u32 2147483648, %v78_v50  ;;  %v146_v57 = vxor.u32 2147483648, %v79_v51  ;;  %v147_v60 = vxor.u32 2147483648, %v80_v52 }
  0x22   :  { %v148_v61 = vxor.u32 2147483648, %v81_v53 }
  0x23   :  { %vm84_vm0 = vcmp.ge.s32.totalorder %v145_v56, 0  ;;  %vm87_vm1 = vcmp.ge.s32.totalorder %v146_v57, 0  ;;  %vm90_vm3 = vcmp.ge.s32.totalorder %v147_v60, 0 }
  0x24   :  { %vm93_vm4 = vcmp.ge.s32.totalorder %v148_v61, 0  ;;  %v105_v62 = vsel %vm84_vm0, %v97_v54, 0.0  ;;  %v106_v63 = vsel %vm87_vm1, %v98_v55, 0.0  ;;  %v107_v1 = vsel %vm90_vm3, %v99_v58, 0.0 }
  0x25   :  { %v108_v2 = vsel %vm93_vm4, %v100_v59, 0.0  ;;  %v113_v3 = vrot.slane %v106_v63, 7  ;;  %v114_v4 = vrot.slane %v107_v1, 6 }
  0x26   :  { %v115_v5 = vrot.slane %v108_v2, 5 }
  0x27   :  { %v117_v6 = vsel %vm116_vm2, %v105_v62, %v113_v3 }
  0x28   :  { %v119_v7 = vsel %vm118_vm5, %v114_v4, %v115_v5 }
  0x29   :  { %v121_v8 = vsel %vm120_vm6, %v117_v6, %v119_v7 }
  0x2a   :  { %127 = vst.msk [vmem:[#allocation7] sm:$0xf] %vm125_vm7, %v121_v8 }
  0x2b   :  { %138 = dma.vmem_to_hbm [thread:$0]  %s134_s1, 64, %s136_s19, [#allocation6]  }
  0x2c   :  { %201 = dma.done.wait [#allocation6], 64  }
  0x2d   :  { %202 = vsyncadd [#allocation6], 4294967232 }
  0x2e   :  { %143 = vsyncpa [#allocation5], 1 }
  0x2f   :  { %144 = vsyncpa [#allocation6], 1 }

</bundles_post_ra>
